<compile_context>
chip_gen: v7x
topology: tpu7x:2x2x1
jax: 0.10.0
libtpu: 0.0.40
codegen_flags: <defaults>
</compile_context>

<pallas_src>
import functools

import jax
import jax.numpy as jnp
from jax import lax
from jax.experimental import pallas as pl
from jax.experimental.pallas import tpu as pltpu


def _combined_loss_kernel(logits_ref, targets_ref, comb_ref, ce_ref, acc_ref,
                          *, alpha, smooth, n_pixels, hw, rows_tile,
                          needs_mask):
    n = pl.program_id(0)
    t = pl.program_id(1)

    @pl.when(jnp.logical_and(n == 0, t == 0))
    def _():
        acc_ref[...] = jnp.zeros_like(acc_ref)

    # Block layouts: logits (1, C, rows_tile, 128), targets (1, rows_tile, 128)
    logits = logits_ref[...][0].astype(jnp.float32)     # (C, R, 128)
    targets = targets_ref[...][0].astype(jnp.int32)     # (R, 128)
    C = logits.shape[0]

    # Numerically stable softmax over the (small) class axis: C-1 elementwise
    # VPU ops over dense (R, 128) vregs.
    m = jnp.max(logits, axis=0, keepdims=True)          # (1, R, 128)
    e = jnp.exp(logits - m)                             # (C, R, 128)
    denom = jnp.sum(e, axis=0, keepdims=True)           # (1, R, 128)
    prob1 = e[1] / denom[0]                             # (R, 128) P(class 1)

    mask = (targets == 1).astype(jnp.float32)           # (R, 128)

    # Per-pixel cross entropy: logsumexp(logits) - logits[target]
    lse = (m + jnp.log(denom))[0]                       # (R, 128)
    class_ids = lax.broadcasted_iota(jnp.int32, logits.shape, 0)
    sel = jnp.sum(jnp.where(class_ids == targets[None], logits, 0.0),
                  axis=0)                               # (R, 128)
    ce_pix = lse - sel                                  # (R, 128)

    if needs_mask:
        # Padding pixels (flattened position >= H*W) contribute nothing.
        row = lax.broadcasted_iota(jnp.int32, (logits.shape[1], 128), 0)
        lane = lax.broadcasted_iota(jnp.int32, (logits.shape[1], 128), 1)
        pos = (t * rows_tile + row) * 128 + lane
        valid = (pos < hw).astype(jnp.float32)
        prob1 = prob1 * valid
        mask = mask * valid
        ce_pix = ce_pix * valid

    # Vector accumulators: pure elementwise VPU adds in the hot loop.
    acc_ref[0] += prob1
    acc_ref[1] += mask
    acc_ref[2] += prob1 * mask
    acc_ref[3] += ce_pix

    last = jnp.logical_and(n == pl.num_programs(0) - 1,
                           t == pl.num_programs(1) - 1)

    @pl.when(last)
    def _():
        sum_p1 = jnp.sum(acc_ref[0])
        sum_mask = jnp.sum(acc_ref[1])
        intersection = jnp.sum(acc_ref[2])
        sum_ce = jnp.sum(acc_ref[3])

        union = sum_p1 + sum_mask
        dice = (2.0 * intersection + smooth) / (union + smooth)
        dice_loss = 1.0 - dice
        ce_mean = sum_ce / n_pixels
        combined = alpha * dice_loss + (1.0 - alpha) * ce_mean
        comb_ref[0, 0] = combined
        ce_ref[0, 0] = ce_mean


def combined_loss(logits_nchw, targets_nhw, *, alpha=0.95, smooth=1.0):
    """Equivalent of CombinedLoss.forward; returns (combined_loss, ce_loss)."""
    N, C, H, W = logits_nchw.shape
    assert C >= 2, "dice term uses softmax prob of class 1; need C >= 2"
    HW = H * W
    n_pixels = N * HW

    # --- tile sizing: big lane-dense tiles (target ~2 MiB logits block) ---
    rows = pl.cdiv(HW, 128)                              # 128-lane rows/image
    itemsize = jnp.dtype(logits_nchw.dtype).itemsize
    max_rows = max(8, (2 * 1024 * 1024) // (C * 128 * itemsize))
    max_rows = min(512, (max_rows // 8) * 8)             # multiple of 8, <=64K lanes
    rows_tile = rows if rows <= max_rows else max_rows
    rows_pad = pl.cdiv(rows, rows_tile) * rows_tile
    hw_pad = rows_pad * 128
    needs_mask = hw_pad != HW
    num_tiles = rows_pad // rows_tile

    # --- free reshapes only (no transpose, no dtype change on the host) ---
    logits_flat = logits_nchw.reshape(N, C, HW)
    targets_flat = targets_nhw.reshape(N, HW)
    if needs_mask:
        logits_flat = jnp.pad(logits_flat, ((0, 0), (0, 0), (0, hw_pad - HW)))
        targets_flat = jnp.pad(targets_flat, ((0, 0), (0, hw_pad - HW)))
    logits_blocks = logits_flat.reshape(N, C, rows_pad, 128)
    targets_blocks = targets_flat.reshape(N, rows_pad, 128)

    kernel = functools.partial(
        _combined_loss_kernel,
        alpha=float(alpha),
        smooth=float(smooth),
        n_pixels=float(n_pixels),
        hw=HW,
        rows_tile=rows_tile,
        needs_mask=needs_mask,
    )

    out_shape = (jax.ShapeDtypeStruct((1, 1), jnp.float32),
                 jax.ShapeDtypeStruct((1, 1), jnp.float32))

    comb, ce = pl.pallas_call(
        kernel,
        out_shape=out_shape,
        grid_spec=pltpu.PrefetchScalarGridSpec(
            num_scalar_prefetch=0,
            grid=(N, num_tiles),
            in_specs=[
                pl.BlockSpec((1, C, rows_tile, 128),
                             lambda n, t: (n, 0, t, 0)),
                pl.BlockSpec((1, rows_tile, 128),
                             lambda n, t: (n, t, 0)),
            ],
            out_specs=[
                pl.BlockSpec((1, 1), lambda n, t: (0, 0),
                             memory_space=pltpu.SMEM),
                pl.BlockSpec((1, 1), lambda n, t: (0, 0),
                             memory_space=pltpu.SMEM),
            ],
            scratch_shapes=[pltpu.VMEM((4, rows_tile, 128), jnp.float32)],
        ),
        compiler_params=pltpu.CompilerParams(
            dimension_semantics=("arbitrary", "arbitrary")),
    )(logits_blocks, targets_blocks)

    # TODO(synk): on v7x the single-accumulator reduction runs on one of the
    # two TensorCores; a per-core partial-sum split could give ~2x there.
    return comb[0, 0], ce[0, 0]


def _reference_combined_loss(logits, targets, alpha=0.95, smooth=1.0):
    """Pure-JAX reference mirroring the PyTorch module."""
    probs = jax.nn.softmax(logits, axis=1)[:, 1, :, :]
    tmask = (targets == 1).astype(jnp.float32)
    intersection = jnp.sum(probs * tmask)
    union = jnp.sum(probs) + jnp.sum(tmask)
    dice = (2.0 * intersection + smooth) / (union + smooth)
    dice_loss = 1.0 - dice

    logp = jax.nn.log_softmax(logits, axis=1)
    ce = -jnp.mean(jnp.take_along_axis(logp, targets[:, None, :, :], axis=1))

    return alpha * dice_loss + (1.0 - alpha) * ce, ce


if __name__ == "__main__":
    key = jax.random.PRNGKey(0)
    k1, k2, k3, k4 = jax.random.split(key, 4)

    # main test: lane-aligned spatial size
    N, C, H, W = 2, 4, 16, 16
    logits = jax.random.normal(k1, (N, C, H, W), dtype=jnp.float32)
    targets = jax.random.randint(k2, (N, H, W), 0, C, dtype=jnp.int32)

    comb, ce = combined_loss(logits, targets)
    jax.block_until_ready((comb, ce))
    ref_comb, ref_ce = _reference_combined_loss(logits, targets)
    assert jnp.allclose(comb, ref_comb, atol=1e-5, rtol=1e-5), (comb, ref_comb)
    assert jnp.allclose(ce, ref_ce, atol=1e-5, rtol=1e-5), (ce, ref_ce)

    # second test: non-128-aligned spatial size exercises the padding mask
    H2, W2 = 10, 10
    logits2 = jax.random.normal(k3, (N, C, H2, W2), dtype=jnp.float32)
    targets2 = jax.random.randint(k4, (N, H2, W2), 0, C, dtype=jnp.int32)

    comb2, ce2 = combined_loss(logits2, targets2)
    jax.block_until_ready((comb2, ce2))
    ref_comb2, ref_ce2 = _reference_combined_loss(logits2, targets2)
    assert jnp.allclose(comb2, ref_comb2, atol=1e-5, rtol=1e-5), (comb2, ref_comb2)
    assert jnp.allclose(ce2, ref_ce2, atol=1e-5, rtol=1e-5), (ce2, ref_ce2)

    print("KERNEL_OK")
</pallas_src>

<mosaic_0001>
module attributes {stable_mosaic.version = 11 : i64} {
  func.func @_combined_loss_kernel(%arg0: i32, %arg1: i32, %arg2: memref<1x4x2x128xf32, #tpu.memory_space<vmem>>, %arg3: memref<1x2x128xi32, #tpu.memory_space<vmem>>, %arg4: memref<1x1xf32, #tpu.memory_space<smem>>, %arg5: memref<1x1xf32, #tpu.memory_space<smem>>, %arg6: memref<4x2x128xf32, #tpu.memory_space<vmem>>) attributes {dimension_semantics = [#tpu.dimension_semantics<arbitrary>, #tpu.dimension_semantics<arbitrary>], iteration_bounds = array<i64: 2, 1>, scalar_prefetch = 0 : i64, scratch_operands = 1 : i64, tpu.core_type = #tpu.core_type<tc>, window_params = [{transform_indices = @transform_0, window_bounds = array<i64: 1, 4, 2, 128>}, {transform_indices = @transform_1, window_bounds = array<i64: 1, 2, 128>}, {transform_indices = @transform_2, window_bounds = array<i64: 1, 1>}, {transform_indices = @transform_3, window_bounds = array<i64: 1, 1>}]} {
    %c0_i32 = arith.constant 0 : i32
    %0 = arith.cmpi eq, %arg0, %c0_i32 : i32
    %c0_i32_0 = arith.constant 0 : i32
    %1 = arith.cmpi eq, %arg1, %c0_i32_0 : i32
    %2 = arith.andi %0, %1 : i1
    %3 = arith.extui %2 : i1 to i32
    %c0_i32_1 = arith.constant 0 : i32
    %4 = arith.cmpi ne, %3, %c0_i32_1 : i32
    scf.if %4 {
      %cst_35 = arith.constant 0.000000e+00 : f32
      %65 = vector.broadcast %cst_35 : f32 to vector<4x2x128xf32>
      %c0_36 = arith.constant 0 : index
      %c0_37 = arith.constant 0 : index
      %c0_38 = arith.constant 0 : index
      %66 = vector.load %arg6[%c0_36, %c0_37, %c0_38] : memref<4x2x128xf32, #tpu.memory_space<vmem>>, vector<4x2x128xf32>
      tpu.vector_store %arg6[%c0_36, %c0_37, %c0_38], %65 {strides = array<i32>} : memref<4x2x128xf32, #tpu.memory_space<vmem>>, vector<4x2x128xf32>,
    } else {
    }
    %c0 = arith.constant 0 : index
    %c0_2 = arith.constant 0 : index
    %c0_3 = arith.constant 0 : index
    %c0_4 = arith.constant 0 : index
    %5 = vector.load %arg2[%c0, %c0_2, %c0_3, %c0_4] : memref<1x4x2x128xf32, #tpu.memory_space<vmem>>, vector<1x4x2x128xf32>
    %6 = vector.shape_cast %5 : vector<1x4x2x128xf32> to vector<4x2x128xf32>
    %c0_5 = arith.constant 0 : index
    %c0_6 = arith.constant 0 : index
    %c0_7 = arith.constant 0 : index
    %7 = vector.load %arg3[%c0_5, %c0_6, %c0_7] : memref<1x2x128xi32, #tpu.memory_space<vmem>>, vector<1x2x128xi32>
    %8 = vector.shape_cast %7 : vector<1x2x128xi32> to vector<2x128xi32>
    %cst = arith.constant dense<0xFF800000> : vector<2x128xf32>
    %9 = vector.multi_reduction <maximumf>, %6, %cst [0] : vector<4x2x128xf32> to vector<2x128xf32>
    %10 = vector.shape_cast %9 : vector<2x128xf32> to vector<1x2x128xf32>
    %11 = vector.broadcast %10 : vector<1x2x128xf32> to vector<4x2x128xf32>
    %12 = arith.subf %6, %11 : vector<4x2x128xf32>
    %13 = math.exp %12 : vector<4x2x128xf32>
    %cst_8 = arith.constant dense<0.000000e+00> : vector<2x128xf32>
    %14 = vector.multi_reduction <add>, %13, %cst_8 [0] : vector<4x2x128xf32> to vector<2x128xf32>
    %15 = vector.shape_cast %14 : vector<2x128xf32> to vector<1x2x128xf32>
    %16 = vector.extract_strided_slice %13 {offsets = [1, 0, 0], sizes = [1, 2, 128], strides = [1, 1, 1]} : vector<4x2x128xf32> to vector<1x2x128xf32>
    %17 = vector.shape_cast %16 : vector<1x2x128xf32> to vector<2x128xf32>
    %18 = vector.shape_cast %15 : vector<1x2x128xf32> to vector<2x128xf32>
    %19 = arith.divf %17, %18 : vector<2x128xf32>
    %c1_i32 = arith.constant 1 : i32
    %20 = vector.broadcast %c1_i32 : i32 to vector<2x128xi32>
    %21 = arith.cmpi eq, %8, %20 : vector<2x128xi32>
    %22 = arith.extui %21 : vector<2x128xi1> to vector<2x128xi32>
    %23 = arith.sitofp %22 : vector<2x128xi32> to vector<2x128xf32>
    %24 = math.log %15 : vector<1x2x128xf32>
    %25 = arith.addf %10, %24 : vector<1x2x128xf32>
    %26 = vector.shape_cast %25 : vector<1x2x128xf32> to vector<2x128xf32>
    %27 = tpu.iota {dimensions = array<i32: 0>} : vector<4x2x128xi32>
    %28 = vector.shape_cast %8 : vector<2x128xi32> to vector<1x2x128xi32>
    %29 = vector.broadcast %28 : vector<1x2x128xi32> to vector<4x2x128xi32>
    %30 = arith.cmpi eq, %27, %29 : vector<4x2x128xi32>
    %cst_9 = arith.constant 0.000000e+00 : f32
    %31 = vector.broadcast %cst_9 : f32 to vector<4x2x128xf32>
    %32 = arith.select %30, %6, %31 : vector<4x2x128xi1>, vector<4x2x128xf32>
    %cst_10 = arith.constant dense<0.000000e+00> : vector<2x128xf32>
    %33 = vector.multi_reduction <add>, %32, %cst_10 [0] : vector<4x2x128xf32> to vector<2x128xf32>
    %34 = arith.subf %26, %33 : vector<2x128xf32>
    %c0_11 = arith.constant 0 : index
    %c0_12 = arith.constant 0 : index
    %c0_13 = arith.constant 0 : index
    %35 = vector.load %arg6[%c0_11, %c0_12, %c0_13] : memref<4x2x128xf32, #tpu.memory_space<vmem>>, vector<1x2x128xf32>
    %36 = vector.shape_cast %35 : vector<1x2x128xf32> to vector<2x128xf32>
    %37 = arith.addf %36, %19 : vector<2x128xf32>
    %c0_14 = arith.constant 0 : index
    %c0_15 = arith.constant 0 : index
    %c0_16 = arith.constant 0 : index
    %38 = vector.load %arg6[%c0_14, %c0_15, %c0_16] : memref<4x2x128xf32, #tpu.memory_space<vmem>>, vector<1x2x128xf32>
    %39 = vector.shape_cast %38 : vector<1x2x128xf32> to vector<2x128xf32>
    %40 = vector.shape_cast %37 : vector<2x128xf32> to vector<1x2x128xf32>
    tpu.vector_store %arg6[%c0_14, %c0_15, %c0_16], %40 {strides = array<i32>} : memref<4x2x128xf32, #tpu.memory_space<vmem>>, vector<1x2x128xf32>,
    %c1 = arith.constant 1 : index
    %c0_17 = arith.constant 0 : index
    %c0_18 = arith.constant 0 : index
    %41 = vector.load %arg6[%c1, %c0_17, %c0_18] : memref<4x2x128xf32, #tpu.memory_space<vmem>>, vector<1x2x128xf32>
    %42 = vector.shape_cast %41 : vector<1x2x128xf32> to vector<2x128xf32>
    %43 = arith.addf %42, %23 : vector<2x128xf32>
    %c1_19 = arith.constant 1 : index
    %c0_20 = arith.constant 0 : index
    %c0_21 = arith.constant 0 : index
    %44 = vector.load %arg6[%c1_19, %c0_20, %c0_21] : memref<4x2x128xf32, #tpu.memory_space<vmem>>, vector<1x2x128xf32>
    %45 = vector.shape_cast %44 : vector<1x2x128xf32> to vector<2x128xf32>
    %46 = vector.shape_cast %43 : vector<2x128xf32> to vector<1x2x128xf32>
    tpu.vector_store %arg6[%c1_19, %c0_20, %c0_21], %46 {strides = array<i32>} : memref<4x2x128xf32, #tpu.memory_space<vmem>>, vector<1x2x128xf32>,
    %c2 = arith.constant 2 : index
    %c0_22 = arith.constant 0 : index
    %c0_23 = arith.constant 0 : index
    %47 = vector.load %arg6[%c2, %c0_22, %c0_23] : memref<4x2x128xf32, #tpu.memory_space<vmem>>, vector<1x2x128xf32>
    %48 = vector.shape_cast %47 : vector<1x2x128xf32> to vector<2x128xf32>
    %49 = arith.mulf %19, %23 : vector<2x128xf32>
    %50 = arith.addf %48, %49 : vector<2x128xf32>
    %c2_24 = arith.constant 2 : index
    %c0_25 = arith.constant 0 : index
    %c0_26 = arith.constant 0 : index
    %51 = vector.load %arg6[%c2_24, %c0_25, %c0_26] : memref<4x2x128xf32, #tpu.memory_space<vmem>>, vector<1x2x128xf32>
    %52 = vector.shape_cast %51 : vector<1x2x128xf32> to vector<2x128xf32>
    %53 = vector.shape_cast %50 : vector<2x128xf32> to vector<1x2x128xf32>
    tpu.vector_store %arg6[%c2_24, %c0_25, %c0_26], %53 {strides = array<i32>} : memref<4x2x128xf32, #tpu.memory_space<vmem>>, vector<1x2x128xf32>,
    %c3 = arith.constant 3 : index
    %c0_27 = arith.constant 0 : index
    %c0_28 = arith.constant 0 : index
    %54 = vector.load %arg6[%c3, %c0_27, %c0_28] : memref<4x2x128xf32, #tpu.memory_space<vmem>>, vector<1x2x128xf32>
    %55 = vector.shape_cast %54 : vector<1x2x128xf32> to vector<2x128xf32>
    %56 = arith.addf %55, %34 : vector<2x128xf32>
    %c3_29 = arith.constant 3 : index
    %c0_30 = arith.constant 0 : index
    %c0_31 = arith.constant 0 : index
    %57 = vector.load %arg6[%c3_29, %c0_30, %c0_31] : memref<4x2x128xf32, #tpu.memory_space<vmem>>, vector<1x2x128xf32>
    %58 = vector.shape_cast %57 : vector<1x2x128xf32> to vector<2x128xf32>
    %59 = vector.shape_cast %56 : vector<2x128xf32> to vector<1x2x128xf32>
    tpu.vector_store %arg6[%c3_29, %c0_30, %c0_31], %59 {strides = array<i32>} : memref<4x2x128xf32, #tpu.memory_space<vmem>>, vector<1x2x128xf32>,
    %c1_i32_32 = arith.constant 1 : i32
    %60 = arith.cmpi eq, %arg0, %c1_i32_32 : i32
    %c0_i32_33 = arith.constant 0 : i32
    %61 = arith.cmpi eq, %arg1, %c0_i32_33 : i32
    %62 = arith.andi %60, %61 : i1
    %63 = arith.extui %62 : i1 to i32
    %c0_i32_34 = arith.constant 0 : i32
    %64 = arith.cmpi ne, %63, %c0_i32_34 : i32
    scf.if %64 {
      %c0_35 = arith.constant 0 : index
      %c0_36 = arith.constant 0 : index
      %c0_37 = arith.constant 0 : index
      %65 = vector.load %arg6[%c0_35, %c0_36, %c0_37] : memref<4x2x128xf32, #tpu.memory_space<vmem>>, vector<1x2x128xf32>
      %66 = vector.shape_cast %65 : vector<1x2x128xf32> to vector<2x128xf32>
      %67 = vector.shape_cast %66 : vector<2x128xf32> to vector<1x2x128xf32>
      %cst_38 = arith.constant dense<0.000000e+00> : vector<1xf32>
      %68 = vector.multi_reduction <add>, %67, %cst_38 [1, 2] : vector<1x2x128xf32> to vector<1xf32>
      %69 = vector.shape_cast %68 : vector<1xf32> to vector<1x1x1xf32>
      %70 = vector.extract %69[0, 0, 0] : f32 from vector<1x1x1xf32>
      %c1_39 = arith.constant 1 : index
      %c0_40 = arith.constant 0 : index
      %c0_41 = arith.constant 0 : index
      %71 = vector.load %arg6[%c1_39, %c0_40, %c0_41] : memref<4x2x128xf32, #tpu.memory_space<vmem>>, vector<1x2x128xf32>
      %72 = vector.shape_cast %71 : vector<1x2x128xf32> to vector<2x128xf32>
      %73 = vector.shape_cast %72 : vector<2x128xf32> to vector<1x2x128xf32>
      %cst_42 = arith.constant dense<0.000000e+00> : vector<1xf32>
      %74 = vector.multi_reduction <add>, %73, %cst_42 [1, 2] : vector<1x2x128xf32> to vector<1xf32>
      %75 = vector.shape_cast %74 : vector<1xf32> to vector<1x1x1xf32>
      %76 = vector.extract %75[0, 0, 0] : f32 from vector<1x1x1xf32>
      %c2_43 = arith.constant 2 : index
      %c0_44 = arith.constant 0 : index
      %c0_45 = arith.constant 0 : index
      %77 = vector.load %arg6[%c2_43, %c0_44, %c0_45] : memref<4x2x128xf32, #tpu.memory_space<vmem>>, vector<1x2x128xf32>
      %78 = vector.shape_cast %77 : vector<1x2x128xf32> to vector<2x128xf32>
      %79 = vector.shape_cast %78 : vector<2x128xf32> to vector<1x2x128xf32>
      %cst_46 = arith.constant dense<0.000000e+00> : vector<1xf32>
      %80 = vector.multi_reduction <add>, %79, %cst_46 [1, 2] : vector<1x2x128xf32> to vector<1xf32>
      %81 = vector.shape_cast %80 : vector<1xf32> to vector<1x1x1xf32>
      %82 = vector.extract %81[0, 0, 0] : f32 from vector<1x1x1xf32>
      %c3_47 = arith.constant 3 : index
      %c0_48 = arith.constant 0 : index
      %c0_49 = arith.constant 0 : index
      %83 = vector.load %arg6[%c3_47, %c0_48, %c0_49] : memref<4x2x128xf32, #tpu.memory_space<vmem>>, vector<1x2x128xf32>
      %84 = vector.shape_cast %83 : vector<1x2x128xf32> to vector<2x128xf32>
      %85 = vector.shape_cast %84 : vector<2x128xf32> to vector<1x2x128xf32>
      %cst_50 = arith.constant dense<0.000000e+00> : vector<1xf32>
      %86 = vector.multi_reduction <add>, %85, %cst_50 [1, 2] : vector<1x2x128xf32> to vector<1xf32>
      %87 = vector.shape_cast %86 : vector<1xf32> to vector<1x1x1xf32>
      %88 = vector.extract %87[0, 0, 0] : f32 from vector<1x1x1xf32>
      %89 = arith.addf %70, %76 : f32
      %cst_51 = arith.constant 2.000000e+00 : f32
      %90 = arith.mulf %cst_51, %82 : f32
      %cst_52 = arith.constant 1.000000e+00 : f32
      %91 = arith.addf %90, %cst_52 : f32
      %cst_53 = arith.constant 1.000000e+00 : f32
      %92 = arith.addf %89, %cst_53 : f32
      %93 = arith.divf %91, %92 : f32
      %cst_54 = arith.constant 1.000000e+00 : f32
      %94 = arith.subf %cst_54, %93 : f32
      %cst_55 = arith.constant 5.120000e+02 : f32
      %95 = arith.divf %88, %cst_55 : f32
      %cst_56 = arith.constant 0.949999988 : f32
      %96 = arith.mulf %cst_56, %94 : f32
      %cst_57 = arith.constant 5.000000e-02 : f32
      %97 = arith.mulf %cst_57, %95 : f32
      %98 = arith.addf %96, %97 : f32
      %c0_58 = arith.constant 0 : index
      %c0_59 = arith.constant 0 : index
      %99 = memref.load %arg4[%c0_58, %c0_59] : memref<1x1xf32, #tpu.memory_space<smem>>
      memref.store %98, %arg4[%c0_58, %c0_59] : memref<1x1xf32, #tpu.memory_space<smem>>
      %c0_60 = arith.constant 0 : index
      %c0_61 = arith.constant 0 : index
      %100 = memref.load %arg5[%c0_60, %c0_61] : memref<1x1xf32, #tpu.memory_space<smem>>
      memref.store %95, %arg5[%c0_60, %c0_61] : memref<1x1xf32, #tpu.memory_space<smem>>
    } else {
    }
    return
  }
  func.func @transform_0(%arg0: i32, %arg1: i32) -> (i32, i32, i32, i32) {
    %c0_i32 = arith.constant 0 : i32
    %c0_i32_0 = arith.constant 0 : i32
    %c0_i32_1 = arith.constant 0 : i32
    return %arg0, %c0_i32, %arg1, %c0_i32_0 : i32, i32, i32, i32
  }
  func.func @transform_1(%arg0: i32, %arg1: i32) -> (i32, i32, i32) {
    %c0_i32 = arith.constant 0 : i32
    %c0_i32_0 = arith.constant 0 : i32
    return %arg0, %arg1, %c0_i32 : i32, i32, i32
  }
  func.func @transform_2(%arg0: i32, %arg1: i32) -> (i32, i32) {
    %c0_i32 = arith.constant 0 : i32
    %c0_i32_0 = arith.constant 0 : i32
    %c0_i32_1 = arith.constant 0 : i32
    return %c0_i32, %c0_i32_0 : i32, i32
  }
  func.func @transform_3(%arg0: i32, %arg1: i32) -> (i32, i32) {
    %c0_i32 = arith.constant 0 : i32
    %c0_i32_0 = arith.constant 0 : i32
    %c0_i32_1 = arith.constant 0 : i32
    return %c0_i32, %c0_i32_0 : i32, i32
  }
}

</mosaic_0001>

<bundles_post_ra>
// kernel: tpu_custom_call.1
= control target key start
LH: loop header
LB: loop body
LE: loop exit
PB: predicated region body
PF: predicated region fallthrough
CT: control target
= control target key end

     0   :  { %9 = vsyncpa [#allocation4], 0  ;;  %s1021_s0 = inlined_call_operand.hbm [shape: f32[2,4,2,128], index: 0, kind: input, shape index: {}]   ;;  %s1022_s1 = inlined_call_operand.hbm [shape: s32[2,2,128], index: 1, kind: input, shape index: {}]   ;;  %s1023_s2 = inlined_call_operand.hbm [shape: f32[1,1], index: 2, kind: output, shape index: {0}]   ;;  %s1024_s3 = inlined_call_operand.hbm [shape: f32[1,1], index: 3, kind: output, shape index: {1}]  }
   0x1   :  { %11 = vsyncpa [#allocation4 + $0x1], 0 }
   0x2   :  { %12 = vsyncpa [#allocation7], 0 }
   0x3   :  { %14 = vsyncpa [#allocation7 + $0x1], 0 }
   0x4   :  { %15 = vsyncpa [#allocation5], 0 }
   0x5   :  { %16 = vsyncpa [#allocation10], 0  ;;  %s792_s12 = smov 0   ;;  %s794_s13 = smov 0  }
   0x6   :  { %s796_s14 = smov 0   ;;  %s798_s15 = smov 0  }
   0x7   :  { %s800_s16 = smov 0   ;;  %s802_s17 = smov 0  }
   0x8 LB: > { %s491_s18 = sadd.s32 4294967295, %s762_s17   ;;  %s34_s19 = sadd.s32 1, %s758_s16  ;;  %s762_s17 = sphi %s802_s17, %s22_s17   ;;  %s758_s16 = sphi %s800_s16, %s1037_s16   ;;  %s754_s15 = sphi %s798_s15, %s1036_s15   ;;  %s750_s14 = sphi %s796_s14, %s1035_s14   ;;  %s746_s13 = sphi %s794_s13, %s1034_s13   ;;  %s742_s12 = sphi %s792_s12, %s1033_s12  }
   0x9   : > { %p36_p0 = scmp.ge.s32.totalorder %s34_s19, 2  ;;  %s43_s20 = sadd.s32 1, %s750_s14 }
   0xa   : > { %p50_p1 = scmp.ne.s32.totalorder %s750_s14, %s746_s13  ;;  %p51_p2 = scmp.eq.s32.totalorder %s762_s17, 0 }
   0xb   : > { %s1039_s19 = smov (%p36_p0, %s34_s19), 0  ;;  %p56_p4 = scmp.ne.s32.totalorder %s746_s13, %s742_s12 }
   0xc   : > { %p828_p3 = por %p51_p2, %p50_p1  ;;  %s38_s22 = ssub.s32 %s758_s16, %s1039_s19 }
   0xd   : > { %p57_p5 = scmp.eq.s32.totalorder %s491_s18, 0  ;;  %p41_p6 = scmp.eq.s32.totalorder %s38_s22, 0 }
   0xe   : > { %p543_p8 = scmp.lt.s32.totalorder %s762_s17, 2  ;;  %s846_s25 = sand.u32 1, %s750_s14  }
   0xf   : > { %p837_p7 = por %p57_p5, %p56_p4  ;;  %s511_s26 = sshll.u32 %s758_s16, 7 }
  0x10   : > { %s843_s24 = scalar_select %p41_p6, %s750_s14, %s43_s20  }
  0x11   : > { %s1027_s23 = scalar_select %p837_p7, 1, 0 }
  0x12   : > { %s494_s27 = sshll.u32 %s846_s25, 3  ;;  %s853_s30 = scalar_lea.hbm %s1021_s0, %s511_s26 }
  0x13   : > { %s154_s4 = scalar_lea.vmem [#allocation3], %s494_s27  ;;  %p857_p9 = pnand %p543_p8, %p828_p3 }
  0x14   : > { %s162_s5 = sshll.u32 %s154_s4, 4  ;;  %s151_s7 = scalar_lea.sflag [#allocation4], %s846_s25  ;;  %s861_s5 = int_to_ptr.vmem [resolvable:$true] %s162_s5 }
  0x15   : > { %s616_s8 = scalar_lea.hbm %s853_s30, 128  ;;  %p618_p11 = pneg %p857_p9 }
  0x16   : > { %p617_p10 = scmp.ne.s32.totalorder %s853_s30, %s616_s8  ;;  %s621_s11 = scalar_lea.hbm %s1021_s0, 256 }
  0x17   : > { %p622_p0 = scmp.lt.u32.totalorder %s853_s30, %s1021_s0  ;;  %p623_p1 = scmp.lt.u32.totalorder %s621_s11, %s616_s8 }
  0x18   : > { %p619_p12 = pnand %p618_p11, %p617_p10  ;;  %p625_p3 = scmp.lt.u32.totalorder %s616_s8, %s853_s30 }
  0x19   : > { %p624_p2 = por %p623_p1, %p622_p0 }
  0x1a   : > { %p620_p13 = pneg %p619_p12 }
  0x1b   : > { %p626_p4 = por %p625_p3, %p624_p2 }
  0x1d   : > { %p627_p5 = pnand %p626_p4, %p620_p13 }
  0x1f   : > { %630 = shalt.err (!%p627_p5)
}
  0x20   : > { %s631_s21 = scalar_lea.vmem %s861_s5, 128  ;;  %s764_s22 = smov [#allocation3]  }
  0x21   : > { %p632_p6 = scmp.ne.s32.totalorder %s861_s5, %s631_s21  ;;  %s636_s26 = sshll.u32 %s764_s22, 4  ;;  %s637_s26 = int_to_ptr.vmem [resolvable:$false] %s636_s26 }
  0x22   : > { %s638_s27 = scalar_lea.vmem %s637_s26, 256  ;;  %p639_p12 = scmp.lt.s32.totalorder %s861_s5, %s637_s26 }
  0x23   : > { %p634_p8 = pnand %p632_p6, %p618_p11  ;;  %p640_p0 = scmp.lt.s32.totalorder %s638_s27, %s631_s21 }
  0x25   : > { %p635_p10 = pneg %p634_p8  ;;  %p641_p1 = por %p640_p0, %p639_p12 }
  0x27   : > { %p642_p2 = pnand %p641_p1, %p635_p10 }
  0x29   : > { %645 = shalt.err (!%p642_p2)
}
  0x2a   : > { %s765_s28 = smov 32   ;;  %s766_s29 = smov 2  }
  0x2b   : > { %539 = dma.hbm_to_vmem [thread:$0]  (!%p857_p9), %s853_s30, 128, %s861_s5, %s151_s7, %s765_s28, %s765_s28, %s766_s29  }
  0x2c   : > { %p499_p13 = scmp.ge.s32.totalorder %s762_s17, 1  ;;  %p189_p3 = scmp.lt.s32.totalorder %s762_s17, 3 }
  0x2d   : > { %s497_s4 = sshll.u32 %s846_s25, 1  ;;  %s498_s9 = sshll.u32 %s758_s16, 5 }
  0x2e   : > { %p894_p4 = pnand %p499_p13, %p189_p3  ;;  %s176_s10 = scalar_lea.vmem [#allocation6], %s497_s4 }
  0x2f   : > { %s184_s11 = sshll.u32 %s176_s10, 4  ;;  %s902_s21 = scalar_lea.hbm %s1022_s1, %s498_s9  ;;  %s185_s11 = int_to_ptr.vmem [resolvable:$true] %s184_s11 }
  0x30   : > { %s1029_s8 = scalar_select %p894_p4, 1, 0 }
  0x31   : > { %s173_s30 = scalar_lea.sflag [#allocation7], %s846_s25  ;;  %s646_s5 = scalar_lea.hbm %s902_s21, 32 }
  0x32   : > { %p647_p5 = scmp.ne.s32.totalorder %s902_s21, %s646_s5  ;;  %s651_s26 = scalar_lea.hbm %s1022_s1, 64 }
  0x33   : > { %p652_p10 = scmp.lt.u32.totalorder %s902_s21, %s1022_s1  ;;  %p653_p12 = scmp.lt.u32.totalorder %s651_s26, %s646_s5 }
  0x34   : > { %p649_p6 = pnand %p647_p5, %p618_p11  ;;  %p655_p1 = scmp.lt.u32.totalorder %s646_s5, %s902_s21 }
  0x35   : > { %p654_p0 = por %p653_p12, %p652_p10 }
  0x36   : > { %p650_p8 = pneg %p649_p6 }
  0x37   : > { %p656_p2 = por %p655_p1, %p654_p0 }
  0x39   : > { %p657_p13 = pnand %p656_p2, %p650_p8 }
  0x3b   : > { %660 = shalt.err (!%p657_p13)
}
  0x3c   : > { %s661_s25 = scalar_lea.vmem %s185_s11, 32  ;;  %s767_s29 = smov [#allocation6]  }
  0x3d   : > { %p662_p3 = scmp.ne.s32.totalorder %s185_s11, %s661_s25  ;;  %s666_s4 = sshll.u32 %s767_s29, 4  ;;  %s667_s4 = int_to_ptr.vmem [resolvable:$false] %s666_s4 }
  0x3e   : > { %s668_s9 = scalar_lea.vmem %s667_s4, 64  ;;  %p669_p7 = scmp.lt.s32.totalorder %s185_s11, %s667_s4 }
  0x3f   : > { %p664_p5 = pnand %p662_p3, %p618_p11  ;;  %p670_p4 = scmp.lt.s32.totalorder %s668_s9, %s661_s25 }
  0x41   : > { %p665_p6 = pneg %p664_p5  ;;  %p671_p10 = por %p670_p4, %p669_p7 }
  0x43   : > { %p672_p12 = pnand %p671_p10, %p665_p6 }
  0x45   : > { %675 = shalt.err (!%p672_p12)
}
  0x46   : > { %542 = dma.hbm_to_vmem [thread:$0]  (!%p857_p9), %s902_s21, 32, %s185_s11, %s173_s30  }
  0x47   : > { %p1030_p8 = scmp.ne.s32.totalorder %s1029_s8, 0 }
  0x48   : > { %s195_s10 = sand.u32 (!%p1030_p8), 1, %s746_s13   ;;  %p1031_p11 = scmp.ne.s32.totalorder (!%p1030_p8), %s1027_s23, 0 }
  0x49   : > { %193 = sbr.rel (%p1030_p8) target bundleno = 458 (0x1ca), region = 28  ;;  %s500_s12 = sshll.u32 (!%p1030_p8), %s195_s10, 3 }
  0x4a   : > { %s196_s20 = scalar_lea.sflag (!%p1030_p8), [#allocation4], %s195_s10  ;;  %s199_s5 = scalar_lea.vmem (!%p1030_p8), [#allocation3], %s500_s12 }
  0x50   : > { %725 = dma.done.wait (%p1031_p11), %s196_s20, 128  }
  0x51   : > { %727 = vsyncadd (%p1031_p11), %s196_s20, 4294967168  ;;  %s501_s7 = sshll.u32 %s195_s10, 1  ;;  %s205_s22 = scalar_lea.sflag [#allocation7], %s195_s10 }
  0x52   : > { %s208_s6 = scalar_lea.vmem [#allocation6], %s501_s7 }
  0x53   : > { %729 = dma.done.wait (%p1031_p11), %s205_s22, 32  }
  0x54   : > { %731 = vsyncadd (%p1031_p11), %s205_s22, 4294967264  ;;  %p231_p7 = scmp.eq.s32.totalorder %s754_s15, 0 }
  0x55   : > { %v768_v0 = vmov (%p231_p7), 0.0  }
  0x56   : > { %236 = sbr.rel (!%p231_p7) target bundleno = 93 (0x5d), region = 40  ;;  %237 = vst [vmem:[#allocation2] sm:$0x3] (%p231_p7), %v768_v0  ;;  %238 = vst [vmem:[#allocation2 + $0x2] sm:$0x3] (%p231_p7), %v768_v0 }
  0x57   : > { %239 = vst [vmem:[#allocation2 + $0x4] sm:$0x3] (%p231_p7), %v768_v0  ;;  %240 = vst [vmem:[#allocation2 + $0x6] sm:$0x3] (%p231_p7), %v768_v0 }
  0x5d PF: > { %v241_v1 = vld [vmem:[%s199_s5] sm:$0x3]  ;;  %v242_v2 = vld [vmem:[%s199_s5 + $0x2] sm:$0x3]  ;;  %v243_v3 = vld [vmem:[%s199_s5 + $0x4] sm:$0x3] }
  0x5e   : > { %v244_v4 = vld [vmem:[%s199_s5 + $0x6] sm:$0x3]  ;;  %vm246_vm0 = vcmask 1041408   ;;  %v245_v9 = vld [vmem:[%s208_s6] sm:$0x3]  ;;  %v769_v13 = vmov 0.0  }
  0x5f   : > { %v247_v5 = vsel %vm246_vm0, %v241_v1, -inf  ;;  %v248_v6 = vsel %vm246_vm0, %v242_v2, -inf  ;;  %v249_v7 = vsel %vm246_vm0, %v243_v3, -inf  ;;  %v250_v8 = vsel %vm246_vm0, %v244_v4, -inf  ;;  %v300_v12 = vld [vmem:[#allocation2 + $0x2] sm:$0x3] }
  0x60   : > { %v251_v10 = vmax.f32 %v247_v5, %v248_v6  ;;  %v252_v11 = vmax.f32 %v249_v7, %v250_v8  ;;  %vm275_vm1 = vcmp.eq.s32.totalorder %v245_v9, 1  ;;  %p312_p9 = scmp.eq.s32.totalorder %s754_s15, 1  ;;  %vm281_vm2 = vcmp.eq.s32.totalorder %v245_v9, 0  ;;  %v296_v47 = vld [vmem:[#allocation2] sm:$0x3] }
  0x61   : > { %v503_v14 = vsel %vm275_vm1, 1.0, %v769_v13  ;;  %v284_v36 = vsel %vm281_vm2, %v241_v1, 0.0  ;;  %v285_v37 = vsel %vm275_vm1, %v242_v2, 0.0  ;;  %vm282_vm3 = vcmp.eq.s32.totalorder %v245_v9, 2  ;;  %v304_v50 = vld [vmem:[#allocation2 + $0x4] sm:$0x3] }
  0x62   : > { %v253_v15 = vmax.f32 %v251_v10, %v252_v11  ;;  %v301_v16 = vadd.f32 %v503_v14, %v300_v12  ;;  %v288_v38 = vsel %vm246_vm0, %v284_v36, 0.0  ;;  %v289_v39 = vsel %vm246_vm0, %v285_v37, 0.0  ;;  %v309_v57 = vld [vmem:[#allocation2 + $0x6] sm:$0x3] }
  0x63   : > { %v286_v40 = vsel %vm282_vm3, %v243_v3, 0.0  ;;  %vm283_vm4 = vcmp.eq.s32.totalorder %v245_v9, 3  ;;  %v290_v41 = vadd.f32 %v289_v39, %v288_v38 }
  0x64   : > { %v254_v17 = vsub.f32 %v241_v1, %v253_v15  ;;  %v255_v18 = vsub.f32 %v242_v2, %v253_v15  ;;  %v256_v19 = vsub.f32 %v243_v3, %v253_v15  ;;  %v257_v20 = vsub.f32 %v244_v4, %v253_v15  ;;  %302 = vst [vmem:[#allocation2 + $0x2] sm:$0x3] %v301_v16 }
  0x65   : > { %v291_v42 = vsel %vm246_vm0, %v286_v40, 0.0  ;;  %v287_v43 = vsel %vm283_vm4, %v244_v4, 0.0 }
  0x66   : > { %v258_v21 = vmul.f32 1.442695, %v254_v17  ;;  %v260_v22 = vmul.f32 1.442695, %v255_v18  ;;  %v262_v23 = vmul.f32 1.442695, %v256_v19  ;;  %v292_v44 = vadd.f32 %v291_v42, %v290_v41 }
  0x67   : > { %v264_v24 = vmul.f32 1.442695, %v257_v20  ;;  %v293_v45 = vsel %vm246_vm0, %v287_v43, 0.0 }
  0x68   : > { %602 = vpow2.f32 %v258_v21  ;;  %v294_v52 = vadd.f32 %v293_v45, %v292_v44 }
  0x69   : > { %604 = vpow2.f32 %v260_v22 }
  0x6a   : > { %606 = vpow2.f32 %v262_v23 }
  0x6b   : > { %608 = vpow2.f32 %v264_v24  ;;  %v328_v61 = vld [vmem:[#allocation2 + $0x2] sm:$0x3] (%p312_p9) }
  0x6c   : > { %v329_v2 = vsel (%p312_p9), %vm246_vm0, %v328_v61, 0.0 }
  0x72   : > { %v603_v25 = vpop.eup %602 }
  0x73   : > { %v605_v26 = vpop.eup %604  ;;  %v266_v27 = vsel %vm246_vm0, %v603_v25, 0.0 }
  0x74   : > { %v607_v28 = vpop.eup %606  ;;  %v267_v29 = vsel %vm246_vm0, %v605_v26, 0.0 }
  0x75   : > { %v609_v30 = vpop.eup %608  ;;  %v268_v31 = vadd.f32 %v267_v29, %v266_v27  ;;  %v269_v32 = vsel %vm246_vm0, %v607_v28, 0.0 }
  0x76   : > { %v271_v33 = vsel %vm246_vm0, %v609_v30, 0.0 }
  0x77   : > { %v270_v34 = vadd.f32 %v269_v32, %v268_v31 }
  0x79   : > { %v272_v35 = vadd.f32 %v271_v33, %v270_v34 }
  0x7b   : > { %610 = vrcp.f32 %v272_v35 }
  0x7c   : > { %612 = vlog2.f32 %v272_v35 }
  0x85   : > { %v611_v46 = vpop.eup %610 }
  0x86   : > { %v613_v48 = vpop.eup %612  ;;  %v274_v49 = vmul.f32 %v611_v46, %v605_v26 }
  0x87   : > { %v279_v51 = vmul.f32 0.6931472, %v613_v48 }
  0x88   : > { %v297_v53 = vadd.f32 %v296_v47, %v274_v49  ;;  %v305_v54 = vmul.f32 %v503_v14, %v274_v49 }
  0x89   : > { %v280_v55 = vadd.f32 %v279_v51, %v253_v15  ;;  %316 = sbr.rel (!%p312_p9) target bundleno = 430 (0x1ae), region = 44 }
  0x8a   : > { %298 = vst [vmem:[#allocation2] sm:$0x3] %v297_v53  ;;  %v306_v56 = vadd.f32 %v305_v54, %v304_v50 }
  0x8b   : > { %v295_v58 = vsub.f32 %v280_v55, %v294_v52 }
  0x8c   : > { %307 = vst [vmem:[#allocation2 + $0x4] sm:$0x3] %v306_v56 }
  0x8d   : > { %v310_v59 = vadd.f32 %v309_v57, %v295_v58 }
  0x8f   : > { %311 = vst [vmem:[#allocation2 + $0x6] sm:$0x3] %v310_v59 }
  0x91   : > { %v317_v60 = vld [vmem:[#allocation2] sm:$0x3] }
  0x92   : > { %v318_v63 = vsel %vm246_vm0, %v317_v60, 0.0 }
  0x93   : > { %v339_v62 = vld [vmem:[#allocation2 + $0x4] sm:$0x3]  ;;  %319 = vadd.xlane.f32.xlu0 %v318_v63 }
  0x94   : > { %v340_v0 = vsel %vm246_vm0, %v339_v62, 0.0 }
  0x95   : > { %341 = vadd.xlane.f32.xlu1 %v340_v0 }
  0x96   : > { %v350_v1 = vld [vmem:[#allocation2 + $0x6] sm:$0x3] }
  0x97   : > { %v351_v3 = vsel %vm246_vm0, %v350_v1, 0.0  ;;  %330 = vadd.xlane.f32.xlu0 %v329_v2 }
  0x99   : > { %352 = vadd.xlane.f32.xlu1 %v351_v3 }
 0x120   : > { %v320_v4 = vpop.xlane.xlu0 %319 }
 0x121   : > { %v321_v6 = vrot.slane %v320_v4, 4 }
 0x122   : > { %v342_v5 = vpop.xlane.xlu1 %341 }
 0x123   : > { %v343_v7 = vrot.slane %v342_v5, 4  ;;  %v322_v8 = vadd.f32 %v321_v6, %v320_v4 }
 0x124   : > { %v331_v10 = vpop.xlane.xlu0 %330 }
 0x125   : > { %v344_v9 = vadd.f32 %v343_v7, %v342_v5  ;;  %v323_v12 = vrot.slane %v322_v8, 2  ;;  %v332_v13 = vrot.slane %v331_v10, 4 }
 0x126   : > { %v353_v11 = vpop.xlane.xlu1 %352 }
 0x127   : > { %v345_v14 = vrot.slane %v344_v9, 2  ;;  %v354_v15 = vrot.slane %v353_v11, 4  ;;  %v333_v16 = vadd.f32 %v332_v13, %v331_v10  ;;  %v324_v17 = vadd.f32 %v323_v12, %v322_v8 }
 0x129   : > { %v355_v18 = vadd.f32 %v354_v15, %v353_v11  ;;  %v346_v19 = vadd.f32 %v345_v14, %v344_v9  ;;  %v334_v20 = vrot.slane %v333_v16, 2  ;;  %v325_v21 = vrot.slane %v324_v17, 1 }
 0x12b   : > { %v356_v22 = vrot.slane %v355_v18, 2  ;;  %v347_v23 = vrot.slane %v346_v19, 1  ;;  %v335_v24 = vadd.f32 %v334_v20, %v333_v16  ;;  %v326_v25 = vadd.f32 %v325_v21, %v324_v17 }
 0x12d   : > { %v357_v26 = vadd.f32 %v356_v22, %v355_v18  ;;  %514 = vpush %v326_v25  ;;  %v336_v27 = vrot.slane %v335_v24, 1  ;;  %v348_v29 = vadd.f32 %v347_v23, %v346_v19 }
 0x12f   : > { %v358_v28 = vrot.slane %v357_v26, 1  ;;  %v337_v30 = vadd.f32 %v336_v27, %v335_v24 }
 0x131   : > { %v359_v31 = vadd.f32 %v358_v28, %v357_v26  ;;  %516 = vpush %v337_v30 }
 0x132   : > { %518 = vpush %v348_v29 }
 0x133   : > { %520 = vpush %v359_v31 }
 0x15e   : > { %s515_s15 = spop %514 }
 0x162   : > { %s517_s23 = spop %516 }
 0x163   : > { %s361_s8 = sadd.f32 %s517_s23, %s515_s15  ;;  %s519_s11 = spop %518 }
 0x164   : > { %s521_s21 = spop %520  ;;  %s362_s27 = smul.f32 2.0, %s519_s11 }
 0x165   : > { %s364_s30 = sadd.f32 1.0, %s361_s8  ;;  %s372_s26 = smul.f32 0.001953125, %s521_s21 }
 0x166   : > { %s363_s28 = sadd.f32 1.0, %s362_s27 }
 0x167   : > { %v365_v32 = vstv %s364_s30  ;;  %379 = sst [smem:[#allocation9]] %s372_s26  ;;  %s374_s9 = smul.f32 0.05, %s372_s26 }
 0x168   : > { %614 = vrcp.f32 %v365_v32 }
 0x172   : > { %v615_v33 = vpop.eup %614 }
 0x173   : > { %522 = vpush %v615_v33 }
 0x1a4   : > { %s523_s25 = spop %522 }
 0x1a5   : > { %s368_s29 = smul.f32 %s523_s25, %s363_s28 }
 0x1a7   : > { %s369_s4 = ssub.f32 1.0, %s368_s29 }
 0x1a9   : > { %s373_s10 = smul.f32 0.95, %s369_s4 }
 0x1ab   : > { %s375_s12 = sadd.f32 %s374_s9, %s373_s10 }
 0x1ad   : > { %377 = sst [smem:[#allocation8]] %s375_s12 }
 0x1ae PF: > { %p959_p4 = scmp.eq.s32.totalorder %s491_s18, 1  ;;  %s676_s22 = scalar_lea.hbm %s1023_s2, 16 }
 0x1af   : > { %p677_p0 = scmp.ne.s32.totalorder %s1023_s2, %s676_s22  ;;  %p682_p13 = scmp.lt.u32.totalorder %s676_s22, %s1023_s2 }
 0x1b1   : > { %p678_p1 = pnand %p677_p0, %p959_p4 }
 0x1b3   : > { %p679_p2 = pneg %p678_p1 }
 0x1b5   : > { %p684_p3 = pnand %p682_p13, %p679_p2 }
 0x1b7   : > { %687 = shalt.err (!%p684_p3)
}
 0x1b8   : > { %s770_s18 = smov [#allocation8]   ;;  %s688_s27 = scalar_lea.hbm %s1024_s3, 16 }
 0x1b9   : > { %529 = dma.smem_to_hbm (%p959_p4), %s770_s18, 16, %s1023_s2, [#allocation5]  }
 0x1ba   : > { %p689_p5 = scmp.ne.s32.totalorder %s1024_s3, %s688_s27  ;;  %p694_p12 = scmp.lt.u32.totalorder %s688_s27, %s1024_s3 }
 0x1bc   : > { %p690_p6 = pnand %p689_p5, %p959_p4 }
 0x1be   : > { %p691_p10 = pneg %p690_p6 }
 0x1c0   : > { %p696_p8 = pnand %p694_p12, %p691_p10 }
 0x1c2   : > { %699 = shalt.err (!%p696_p8)
}
 0x1c3   : > { %s771_s9 = smov [#allocation9]  }
 0x1c4   : > { %531 = dma.smem_to_hbm (%p959_p4), %s771_s9, 16, %s1024_s3, [#allocation10]  }
 0x1c5   : > { %733 = dma.done.wait (%p959_p4), [#allocation5], 16  }
 0x1c6   : > { %735 = vsyncadd (%p959_p4), [#allocation5], 4294967280 }
 0x1c7   : > { %737 = dma.done.wait (%p959_p4), [#allocation10], 16  }
 0x1c8   : > { %739 = vsyncadd (%p959_p4), [#allocation10], 4294967280 }
 0x1c9   : > { %406 = sfence }
 0x1ca PF: > { %s22_s17 = sadd.s32 1, %s762_s17   ;;  %s1033_s12 = smov %s746_s13 }
 0x1cb   : > { %p19_p11 = scmp.ge.s32.totalorder %s22_s17, 4   ;;  %s1034_s13 = smov %s750_s14 }
 0x1cc   : > { %s1035_s14 = smov %s843_s24  ;;  %s1036_s15 = smov %s758_s16 }
 0x1cd   : > { %s1037_s16 = smov %s1039_s19  ;;  %21 = sbr.rel (!%p19_p11) target bundleno = 8 (0x8), region = 99 }
 0x1d4   :  { %412 = vsyncpa [#allocation4], 1 }
 0x1d5   :  { %414 = vsyncpa [#allocation4 + $0x1], 1 }
 0x1d6   :  { %415 = vsyncpa [#allocation7], 1 }
 0x1d7   :  { %417 = vsyncpa [#allocation7 + $0x1], 1 }
 0x1d8   :  { %418 = vsyncpa [#allocation5], 1 }
 0x1d9   :  { %420 = vsyncpa [#allocation5 + $0x1], 1 }
 0x1da   :  { %421 = vsyncpa [#allocation10], 1 }

</bundles_post_ra>
